<compile_context>
chip_gen: v7x
topology: tpu7x:2x2x1
jax: 0.10.0
libtpu: 0.0.40
codegen_flags: <defaults>
</compile_context>

<pallas_src>
import jax
import jax.numpy as jnp
from jax.experimental import pallas as pl
from jax.experimental.pallas import tpu as pltpu

H1 = 32
H2 = 32
IN_DIM = 3
OUT_DIM = 2

# Largest batch tile (lane width) per grid step.  VMEM per step is roughly
# 0.4 KB * tn: xT (8 sublanes x tn) and out (8 x tn) blocks double-buffered,
# plus the (32, tn) f32 h1/h2 temporaries.  32768 lanes ~= 13 MiB.
TN_MAX = 32768
VMEM_LIMIT_BYTES = 48 * 1024 * 1024


def mlp_kernel(xT_ref, w1_ref, b1_ref, w2_ref, b2_ref, w3_ref, b3_ref, oT_ref):
    # xT_ref: (IN_DIM, tn)   batch tile on lanes
    # w*_ref: PyTorch layout (out, in); b*_ref: (out, 1) columns
    xT = xT_ref[...].astype(jnp.float32)
    w1 = w1_ref[...]

    # fc1: K=3 contraction as three VPU FMAs (avoids a near-empty MXU pass).
    h1 = (w1[:, 0:1] * xT[0:1, :]
          + w1[:, 1:2] * xT[1:2, :]
          + w1[:, 2:3] * xT[2:3, :]
          + b1_ref[...])                          # (H1, tn)
    h1 = jnp.maximum(h1, 0.0)

    # fc2: (H2, H1) @ (H1, tn) -> lane-dense MXU matmul, f32 accumulation.
    h2 = jnp.dot(w2_ref[...], h1, preferred_element_type=jnp.float32) + b2_ref[...]
    h2 = jnp.maximum(h2, 0.0)

    # fc3: (OUT_DIM, H2) @ (H2, tn) -> (OUT_DIM, tn), lane-dense output block.
    y = jnp.dot(w3_ref[...], h2, preferred_element_type=jnp.float32) + b3_ref[...]
    oT_ref[...] = y.astype(oT_ref.dtype)


def _cdiv(a, b):
    return -(-a // b)


def _round_up(a, m):
    return _cdiv(a, m) * m


def _tile_plan(B):
    """Pick (tile_width, num_tiles) for the batch/lane axis.

    Goals (per the perf review):
      * as few grid steps as possible -- the kernel is step-overhead bound
        (~0.35us/step vs tens of ns of HBM traffic per tile),
      * once B is large enough, an EVEN tile count >= 2 so v7x's two
        TensorCores both get work via the "parallel" grid axis (costs at most
        one extra ~0.35us step on single-TC v5e/v6e -- negligible),
      * tn <= TN_MAX so VMEM stays inside the v7x budget.
    """
    if B < 256:
        # One full-array block: lane width equals the full batch dim, so no
        # padding and no ragged edge at all.
        return B, 1
    num_tiles = max(2, 2 * _cdiv(B, 2 * TN_MAX))   # smallest even count with tn <= TN_MAX
    tn = _round_up(_cdiv(B, num_tiles), 128)
    return tn, _cdiv(B, tn)


@jax.jit
def test_cnn_forward(x, w1, b1, w2, b2, w3, b3):
    """x: (B, IN_DIM); weights in PyTorch (out, in) layout; biases (out,)."""
    B = x.shape[0]
    tn, num_tiles = _tile_plan(B)

    # Transpose to (features, batch) so blocks are lane-dense and VMEM-lean.
    # No jnp.pad: ragged final block (if any) is handled by Pallas masking.
    xT = x.T                                     # (IN_DIM, B)

    # Biases as column vectors so they broadcast over the lane (batch) axis.
    b1c = b1.reshape(H1, 1)
    b2c = b2.reshape(H2, 1)
    b3c = b3.reshape(OUT_DIM, 1)

    # Weights/biases use constant index maps: the pipeline only re-fetches a
    # block whose index changed, so they are fetched once and stay resident.
    # (pl.Buffered(1) would also drop their redundant second buffer, but at
    #  <20 KiB total that is not worth the extra lowering surface.)
    in_specs = [
        pl.BlockSpec((IN_DIM, tn), lambda i: (0, i)),      # xT batch tile
        pl.BlockSpec((H1, IN_DIM), lambda i: (0, 0)),      # w1 (resident)
        pl.BlockSpec((H1, 1), lambda i: (0, 0)),           # b1
        pl.BlockSpec((H2, H1), lambda i: (0, 0)),          # w2
        pl.BlockSpec((H2, 1), lambda i: (0, 0)),           # b2
        pl.BlockSpec((OUT_DIM, H2), lambda i: (0, 0)),     # w3
        pl.BlockSpec((OUT_DIM, 1), lambda i: (0, 0)),      # b3
    ]
    out_spec = pl.BlockSpec((OUT_DIM, tn), lambda i: (0, i))

    outT = pl.pallas_call(
        mlp_kernel,
        out_shape=jax.ShapeDtypeStruct((OUT_DIM, B), x.dtype),
        grid_spec=pltpu.PrefetchScalarGridSpec(
            num_scalar_prefetch=0,
            grid=(num_tiles,),
            in_specs=in_specs,
            out_specs=out_spec,
        ),
        compiler_params=pltpu.CompilerParams(
            dimension_semantics=("parallel",),
            vmem_limit_bytes=VMEM_LIMIT_BYTES,
        ),
    )(xT, w1, b1c, w2, b2c, w3, b3c)

    # Back to PyTorch (batch, features) convention.
    return outT.T


def init_linear_params(key, fan_in, fan_out):
    # PyTorch nn.Linear default init: U(-1/sqrt(fan_in), 1/sqrt(fan_in)),
    # weight stored in PyTorch layout (out, in), bias (out,).
    kw, kb = jax.random.split(key)
    bound = 1.0 / jnp.sqrt(float(fan_in))
    w = jax.random.uniform(kw, (fan_out, fan_in), jnp.float32, -bound, bound)
    b = jax.random.uniform(kb, (fan_out,), jnp.float32, -bound, bound)
    return w, b


def reference_forward(x, w1, b1, w2, b2, w3, b3):
    h1 = jnp.maximum(x @ w1.T + b1, 0.0)
    h2 = jnp.maximum(h1 @ w2.T + b2, 0.0)
    return h2 @ w3.T + b3


if __name__ == "__main__":
    key = jax.random.PRNGKey(0)
    kx, k1, k2, k3 = jax.random.split(key, 4)

    B = 8
    x = jax.random.normal(kx, (B, IN_DIM), jnp.float32)

    w1, b1 = init_linear_params(k1, IN_DIM, H1)
    w2, b2 = init_linear_params(k2, H1, H2)
    w3, b3 = init_linear_params(k3, H2, OUT_DIM)

    out = test_cnn_forward(x, w1, b1, w2, b2, w3, b3)
    out = jax.block_until_ready(out)

    ref = reference_forward(x, w1, b1, w2, b2, w3, b3)
    assert out.shape == (B, OUT_DIM)
    assert jnp.allclose(out, ref, atol=1e-5, rtol=1e-5), "mismatch vs reference"

    print("KERNEL_OK")
</pallas_src>

<mosaic_0001>
module attributes {stable_mosaic.version = 11 : i64} {
  func.func @mlp_kernel(%arg0: i32, %arg1: memref<3x8xf32, #tpu.memory_space<vmem>>, %arg2: memref<32x3xf32, #tpu.memory_space<vmem>>, %arg3: memref<32x1xf32, #tpu.memory_space<vmem>>, %arg4: memref<32x32xf32, #tpu.memory_space<vmem>>, %arg5: memref<32x1xf32, #tpu.memory_space<vmem>>, %arg6: memref<2x32xf32, #tpu.memory_space<vmem>>, %arg7: memref<2x1xf32, #tpu.memory_space<vmem>>, %arg8: memref<2x8xf32, #tpu.memory_space<vmem>>) attributes {dimension_semantics = [#tpu.dimension_semantics<parallel>], iteration_bounds = array<i64: 1>, scalar_prefetch = 0 : i64, scratch_operands = 0 : i64, tpu.core_type = #tpu.core_type<tc>, window_params = [{transform_indices = @transform_0, window_bounds = array<i64: 3, 8>}, {pipeline_mode = #tpu.pipeline_mode<synchronous>, transform_indices = @transform_1, window_bounds = array<i64: 32, 3>}, {pipeline_mode = #tpu.pipeline_mode<synchronous>, transform_indices = @transform_2, window_bounds = array<i64: 32, 1>}, {pipeline_mode = #tpu.pipeline_mode<synchronous>, transform_indices = @transform_3, window_bounds = array<i64: 32, 32>}, {pipeline_mode = #tpu.pipeline_mode<synchronous>, transform_indices = @transform_4, window_bounds = array<i64: 32, 1>}, {pipeline_mode = #tpu.pipeline_mode<synchronous>, transform_indices = @transform_5, window_bounds = array<i64: 2, 32>}, {pipeline_mode = #tpu.pipeline_mode<synchronous>, transform_indices = @transform_6, window_bounds = array<i64: 2, 1>}, {transform_indices = @transform_7, window_bounds = array<i64: 2, 8>}]} {
    %c0 = arith.constant 0 : index
    %c0_0 = arith.constant 0 : index
    %0 = vector.load %arg1[%c0, %c0_0] : memref<3x8xf32, #tpu.memory_space<vmem>>, vector<3x8xf32>
    %c0_1 = arith.constant 0 : index
    %c0_2 = arith.constant 0 : index
    %1 = vector.load %arg2[%c0_1, %c0_2] : memref<32x3xf32, #tpu.memory_space<vmem>>, vector<32x3xf32>
    %2 = vector.extract_strided_slice %1 {offsets = [0, 0], sizes = [32, 1], strides = [1, 1]} : vector<32x3xf32> to vector<32x1xf32>
    %3 = vector.extract_strided_slice %0 {offsets = [0, 0], sizes = [1, 8], strides = [1, 1]} : vector<3x8xf32> to vector<1x8xf32>
    %4 = vector.broadcast %2 : vector<32x1xf32> to vector<32x8xf32>
    %5 = vector.broadcast %3 : vector<1x8xf32> to vector<32x8xf32>
    %6 = arith.mulf %4, %5 : vector<32x8xf32>
    %7 = vector.extract_strided_slice %1 {offsets = [0, 1], sizes = [32, 1], strides = [1, 1]} : vector<32x3xf32> to vector<32x1xf32>
    %8 = vector.extract_strided_slice %0 {offsets = [1, 0], sizes = [1, 8], strides = [1, 1]} : vector<3x8xf32> to vector<1x8xf32>
    %9 = vector.broadcast %7 : vector<32x1xf32> to vector<32x8xf32>
    %10 = vector.broadcast %8 : vector<1x8xf32> to vector<32x8xf32>
    %11 = arith.mulf %9, %10 : vector<32x8xf32>
    %12 = arith.addf %6, %11 : vector<32x8xf32>
    %13 = vector.extract_strided_slice %1 {offsets = [0, 2], sizes = [32, 1], strides = [1, 1]} : vector<32x3xf32> to vector<32x1xf32>
    %14 = vector.extract_strided_slice %0 {offsets = [2, 0], sizes = [1, 8], strides = [1, 1]} : vector<3x8xf32> to vector<1x8xf32>
    %15 = vector.broadcast %13 : vector<32x1xf32> to vector<32x8xf32>
    %16 = vector.broadcast %14 : vector<1x8xf32> to vector<32x8xf32>
    %17 = arith.mulf %15, %16 : vector<32x8xf32>
    %18 = arith.addf %12, %17 : vector<32x8xf32>
    %c0_3 = arith.constant 0 : index
    %c0_4 = arith.constant 0 : index
    %19 = vector.load %arg3[%c0_3, %c0_4] : memref<32x1xf32, #tpu.memory_space<vmem>>, vector<32x1xf32>
    %20 = vector.broadcast %19 : vector<32x1xf32> to vector<32x8xf32>
    %21 = arith.addf %18, %20 : vector<32x8xf32>
    %cst = arith.constant 0.000000e+00 : f32
    %22 = vector.broadcast %cst : f32 to vector<32x8xf32>
    %23 = arith.maximumf %21, %22 : vector<32x8xf32>
    %c0_5 = arith.constant 0 : index
    %c0_6 = arith.constant 0 : index
    %24 = vector.load %arg4[%c0_5, %c0_6] : memref<32x32xf32, #tpu.memory_space<vmem>>, vector<32x32xf32>
    %cst_7 = arith.constant dense<0.000000e+00> : vector<32x8xf32>
    %25 = tpu.matmul %24, %23, %cst_7 {dimension_numbers = #tpu.dot_dimension_numbers<[1], [0], [0], [1], [0, 0, 1, 1], [], []>} : vector<32x32xf32>, vector<32x8xf32>, vector<32x8xf32> -> vector<32x8xf32>
    %c0_8 = arith.constant 0 : index
    %c0_9 = arith.constant 0 : index
    %26 = vector.load %arg5[%c0_8, %c0_9] : memref<32x1xf32, #tpu.memory_space<vmem>>, vector<32x1xf32>
    %27 = vector.broadcast %26 : vector<32x1xf32> to vector<32x8xf32>
    %28 = arith.addf %25, %27 : vector<32x8xf32>
    %cst_10 = arith.constant 0.000000e+00 : f32
    %29 = vector.broadcast %cst_10 : f32 to vector<32x8xf32>
    %30 = arith.maximumf %28, %29 : vector<32x8xf32>
    %c0_11 = arith.constant 0 : index
    %c0_12 = arith.constant 0 : index
    %31 = vector.load %arg6[%c0_11, %c0_12] : memref<2x32xf32, #tpu.memory_space<vmem>>, vector<2x32xf32>
    %cst_13 = arith.constant dense<0.000000e+00> : vector<2x8xf32>
    %32 = tpu.matmul %31, %30, %cst_13 {dimension_numbers = #tpu.dot_dimension_numbers<[1], [0], [0], [1], [0, 0, 1, 1], [], []>} : vector<2x32xf32>, vector<32x8xf32>, vector<2x8xf32> -> vector<2x8xf32>
    %c0_14 = arith.constant 0 : index
    %c0_15 = arith.constant 0 : index
    %33 = vector.load %arg7[%c0_14, %c0_15] : memref<2x1xf32, #tpu.memory_space<vmem>>, vector<2x1xf32>
    %34 = vector.broadcast %33 : vector<2x1xf32> to vector<2x8xf32>
    %35 = arith.addf %32, %34 : vector<2x8xf32>
    %c0_16 = arith.constant 0 : index
    %c0_17 = arith.constant 0 : index
    %36 = vector.load %arg8[%c0_16, %c0_17] : memref<2x8xf32, #tpu.memory_space<vmem>>, vector<2x8xf32>
    tpu.vector_store %arg8[%c0_16, %c0_17], %35 {strides = array<i32>} : memref<2x8xf32, #tpu.memory_space<vmem>>, vector<2x8xf32>,
    return
  }
  func.func @transform_0(%arg0: i32) -> (i32, i32) {
    %c0_i32 = arith.constant 0 : i32
    %c0_i32_0 = arith.constant 0 : i32
    return %c0_i32, %arg0 : i32, i32
  }
  func.func @transform_1(%arg0: i32) -> (i32, i32) {
    %c0_i32 = arith.constant 0 : i32
    %c0_i32_0 = arith.constant 0 : i32
    %c0_i32_1 = arith.constant 0 : i32
    return %c0_i32, %c0_i32_0 : i32, i32
  }
  func.func @transform_2(%arg0: i32) -> (i32, i32) {
    %c0_i32 = arith.constant 0 : i32
    %c0_i32_0 = arith.constant 0 : i32
    %c0_i32_1 = arith.constant 0 : i32
    return %c0_i32, %c0_i32_0 : i32, i32
  }
  func.func @transform_3(%arg0: i32) -> (i32, i32) {
    %c0_i32 = arith.constant 0 : i32
    %c0_i32_0 = arith.constant 0 : i32
    %c0_i32_1 = arith.constant 0 : i32
    return %c0_i32, %c0_i32_0 : i32, i32
  }
  func.func @transform_4(%arg0: i32) -> (i32, i32) {
    %c0_i32 = arith.constant 0 : i32
    %c0_i32_0 = arith.constant 0 : i32
    %c0_i32_1 = arith.constant 0 : i32
    return %c0_i32, %c0_i32_0 : i32, i32
  }
  func.func @transform_5(%arg0: i32) -> (i32, i32) {
    %c0_i32 = arith.constant 0 : i32
    %c0_i32_0 = arith.constant 0 : i32
    %c0_i32_1 = arith.constant 0 : i32
    return %c0_i32, %c0_i32_0 : i32, i32
  }
  func.func @transform_6(%arg0: i32) -> (i32, i32) {
    %c0_i32 = arith.constant 0 : i32
    %c0_i32_0 = arith.constant 0 : i32
    %c0_i32_1 = arith.constant 0 : i32
    return %c0_i32, %c0_i32_0 : i32, i32
  }
  func.func @transform_7(%arg0: i32) -> (i32, i32) {
    %c0_i32 = arith.constant 0 : i32
    %c0_i32_0 = arith.constant 0 : i32
    return %c0_i32, %arg0 : i32, i32
  }
}

</mosaic_0001>

<bundles_post_ra>
// kernel: test_cnn_forward.1
= control target key start
LH: loop header
LB: loop body
LE: loop exit
PB: predicated region body
PF: predicated region fallthrough
CT: control target
= control target key end

     0   :  { %v470_v1 = vmov 2   ;;  %v471_v2 = vmov 1   ;;  %s591_s0 = inlined_call_operand.vmem [shape: f32[3,8], index: 0, kind: input, shape index: {}]   ;;  %s592_s1 = inlined_call_operand.vmem [shape: f32[32,3], index: 1, kind: input, shape index: {}]   ;;  %s593_s2 = inlined_call_operand.vmem [shape: f32[32,1], index: 2, kind: input, shape index: {}]   ;;  %s594_s3 = inlined_call_operand.vmem [shape: f32[32,32], index: 3, kind: input, shape index: {}]   ;;  %s595_s4 = inlined_call_operand.vmem [shape: f32[32,1], index: 4, kind: input, shape index: {}]   ;;  %s596_s5 = inlined_call_operand.vmem [shape: f32[2,32], index: 5, kind: input, shape index: {}]   ;;  %s597_s6 = inlined_call_operand.vmem [shape: f32[2,1], index: 6, kind: input, shape index: {}]   ;;  %s598_s7 = inlined_call_operand.hbm [shape: f32[2,8], index: 7, kind: output, shape index: {}]  }
   0x1   :  { %v28_v0 = vld [vmem:[%s592_s1] sm:$0xff]  ;;  %439 = vset.pattern.permute.xlu0 %v470_v1  ;;  %438 = vset.pattern.permute.xlu1 %v471_v2  ;;  %v30_v3 = vld [vmem:[%s592_s1 + $0x10] sm:$0xff]  ;;  %v29_v4 = vld [vmem:[%s592_s1 + $0x8] sm:$0xff] }
   0x2   :  { %89 = vperm.xlu0 %439, %v28_v0   ;;  %61 = vperm.xlu1 %438, %v28_v0  }
   0x3   :  { %12 = vsyncpa [#allocation3], 0  ;;  %v472_v5 = vmov 0   ;;  %v31_v6 = vld [vmem:[%s592_s1 + $0x18] sm:$0xff]  ;;  %v117_v7 = vld [vmem:[%s593_s2 + $0x8] sm:$0xff]  ;;  %vm176_vm0 = vcmask 261120   ;;  %v52_v22 = vlaneseq }
   0x4   :  { %v152_v8 = vld [vmem:[%s595_s4] sm:$0xff]  ;;  %v154_v9 = vld [vmem:[%s595_s4 + $0x10] sm:$0xff]  ;;  %v119_v13 = vld [vmem:[%s593_s2 + $0x18] sm:$0xff]  ;;  %vm474_vm1 = vmmov 0   ;;  %s476_s10 = smov [#allocation2]   ;;  %vm358_vm2 = vcmask 58368  }
   0x5   :  { %v279_v10 = vld [vmem:[%s597_s6] sm:$0x3]  ;;  %v118_v12 = vld [vmem:[%s593_s2 + $0x10] sm:$0xff]  ;;  %v153_v14 = vld [vmem:[%s595_s4 + $0x8] sm:$0xff]  ;;  %v53_v24 = vshrl.u32 %v52_v22, 7  ;;  %s366_s11 = sshll.u32 %s476_s10, 4  ;;  %s367_s11 = int_to_ptr.vmem [resolvable:$true] %s366_s11 }
   0x6   :  { %97 = vperm.xlu0 %439, %v30_v3   ;;  %65 = vperm.xlu1 %438, %v29_v4   ;;  %v116_v11 = vld [vmem:[%s593_s2] sm:$0xff]  ;;  %v155_v15 = vld [vmem:[%s595_s4 + $0x18] sm:$0xff]  ;;  %s446_s12 = scalar_lea.vmem %s367_s11, 32  ;;  %p451_p1 = scmp.lt.s32.totalorder %s367_s11, %s367_s11 }
   0x7   :  { %v148_v16 = vld [vmem:[%s594_s3] sm:$0xff]  ;;  %v54_v26 = vsub.s32 0, %v53_v24  ;;  %v78_v28 = vsub.s32 1, %v53_v24  ;;  %v106_v31 = vsub.s32 2, %v53_v24  ;;  %p447_p0 = scmp.ne.s32.totalorder %s367_s11, %s446_s12  ;;  %p452_p2 = scmp.lt.s32.totalorder %s446_s12, %s446_s12 }
   0x8   :  { %400 = vmatprep.mubr.msk.f32.mxu0 %vm176_vm0, %v148_v16  ;;  %v27_v29 = vld [vmem:[%s591_s0] sm:$0x7] }
   0x9   :  { %v55_v32 = vrot.slane %v27_v29, %v54_v26  ;;  %v79_v33 = vrot.slane %v27_v29, %v78_v28  ;;  %v107_v37 = vrot.slane %v27_v29, %v106_v31  ;;  %v278_v31 = vld [vmem:[%s596_s5] sm:$0x3]  ;;  %p453_p3 = por %p452_p2, %p451_p1 }
   0xa   :  { %443 = vset.pattern.permute.xlu0 %v472_v5  ;;  %440 = vset.pattern.permute.xlu1 %v470_v1 }
   0xb   :  { %34 = vperm.xlu0 %443, %v28_v0   ;;  %93 = vperm.xlu1 %440, %v29_v4   ;;  %p454_p4 = pnand %p453_p3, %p447_p0 }
   0xf   :  { %39 = vperm.xlu0 %443, %v29_v4   ;;  %441 = vset.pattern.permute.xlu1 %v472_v5 }
  0x10   :  { %44 = vperm.xlu1 %441, %v30_v3  }
  0x13   :  { %49 = vperm.xlu0 %443, %v31_v6  }
  0x14   :  { %442 = vset.pattern.permute.xlu1 %v471_v2 }
  0x15   :  { %69 = vperm.xlu1 %442, %v30_v3  }
  0x17   :  { %127 = vperm.xlu0 %443, %v117_v7  }
  0x19   :  { %73 = vperm.xlu1 %442, %v31_v6  }
  0x1b   :  { %158 = vperm.xlu0 %443, %v152_v8   ;;  %v149_v8 = vld [vmem:[%s594_s3 + $0x8] sm:$0xff] }
  0x1d   :  { %444 = vset.pattern.permute.xlu1 %v470_v1 }
  0x1e   :  { %101 = vperm.xlu1 %444, %v31_v6  }
  0x1f   :  { %168 = vperm.xlu0 %443, %v154_v9   ;;  %v150_v9 = vld [vmem:[%s594_s3 + $0x10] sm:$0xff] }
  0x22   :  { %445 = vset.pattern.permute.xlu1 %v472_v5 }
  0x23   :  { %282 = vperm.xlu0 %443, %v279_v10   ;;  %122 = vperm.xlu1 %445, %v116_v11   ;;  %v151_v10 = vld [vmem:[%s594_s3 + $0x18] sm:$0xff]  ;;  %v473_v11 = vmov 0.0|0.0  }
  0x24   :  { %425 = vmatprep.subr.bf16.mxu1 %v473_v11 }
  0x27   :  { %132 = vperm.xlu1 %445, %v118_v12   ;;  %v475_v12 = vmov 0.0  }
  0x28   :  { %414 = vmatprep.mubr.msk.f32.mxu1 %vm474_vm1, %v475_v12 }
  0x2b   :  { %137 = vperm.xlu1 %445, %v119_v13  }
  0x2f   :  { %163 = vperm.xlu1 %445, %v153_v14  }
  0x33   :  { %173 = vperm.xlu1 %445, %v155_v15  }
  0x81   :  { %v62_v17 = vpop.permute.xlu1 %61  ;;  %v90_v18 = vpop.permute.xlu0 %89 }
  0x82   :  { %v80_v40 = vmul.f32 %v79_v33, %v62_v17  ;;  %v108_v42 = vmul.f32 %v107_v37, %v90_v18 }
  0x85   :  { %v66_v19 = vpop.permute.xlu1 %65  ;;  %v98_v20 = vpop.permute.xlu0 %97 }
  0x86   :  { %v81_v38 = vmul.f32 %v79_v33, %v66_v19  ;;  %v110_v57 = vmul.f32 %v107_v37, %v98_v20 }
  0x8a   :  { %v94_v21 = vpop.permute.xlu1 %93  ;;  %v35_v23 = vpop.permute.xlu0 %34 }
  0x8b   :  { %v56_v39 = vmul.f32 %v55_v32, %v35_v23  ;;  %v109_v44 = vmul.f32 %v107_v37, %v94_v21 }
  0x8d   :  { %v84_v43 = vadd.f32 %v80_v40, %v56_v39 }
  0x8e   :  { %v40_v27 = vpop.permute.xlu0 %39 }
  0x8f   :  { %v45_v25 = vpop.permute.xlu1 %44  ;;  %v57_v34 = vmul.f32 %v55_v32, %v40_v27  ;;  %v112_v51 = vadd.f32 %v108_v42, %v84_v43 }
  0x90   :  { %v58_v49 = vmul.f32 %v55_v32, %v45_v25 }
  0x91   :  { %v85_v41 = vadd.f32 %v81_v38, %v57_v34 }
  0x92   :  { %v50_v35 = vpop.permute.xlu0 %49 }
  0x93   :  { %v113_v48 = vadd.f32 %v109_v44, %v85_v41  ;;  %v59_v53 = vmul.f32 %v55_v32, %v50_v35 }
  0x94   :  { %v70_v30 = vpop.permute.xlu1 %69 }
  0x95   :  { %v82_v47 = vmul.f32 %v79_v33, %v70_v30 }
  0x96   :  { %v128_v46 = vpop.permute.xlu0 %127 }
  0x97   :  { %v141_v50 = vadd.f32 %v128_v46, %v113_v48  ;;  %v86_v54 = vadd.f32 %v82_v47, %v58_v49 }
  0x98   :  { %v74_v36 = vpop.permute.xlu1 %73 }
  0x99   :  { %v83_v55 = vmul.f32 %v79_v33, %v74_v36  ;;  %v145_v58 = vmax.f32 %v141_v50, 0.0  ;;  %v114_v63 = vadd.f32 %v110_v57, %v86_v54 }
  0x9a   :  { %v159_v14 = vpop.permute.xlu0 %158 }
  0x9b   :  { %v87_v62 = vadd.f32 %v83_v55, %v59_v53 }
  0x9d   :  { %v102_v45 = vpop.permute.xlu1 %101 }
  0x9e   :  { %v111_v59 = vmul.f32 %v107_v37, %v102_v45  ;;  %v169_v23 = vpop.permute.xlu0 %168 }
  0xa0   :  { %v115_v2 = vadd.f32 %v111_v59, %v87_v62 }
  0xa2   :  { %v123_v52 = vpop.permute.xlu1 %122  ;;  %v283_v32 = vpop.permute.xlu0 %282 }
  0xa3   :  { %v140_v56 = vadd.f32 %v123_v52, %v112_v51 }
  0xa5   :  { %v144_v60 = vmax.f32 %v140_v56, 0.0 }
  0xa6   :  { %v133_v61 = vpop.permute.xlu1 %132 }
  0xa7   :  { %v417_v0 = vpack.c.bf16 %v145_v58, %v144_v60  ;;  %v142_v1 = vadd.f32 %v133_v61, %v114_v63 }
  0xa9   :  { %418 = vmatprep.subr.bf16.mxu0 %v417_v0  ;;  %v146_v5 = vmax.f32 %v142_v1, 0.0 }
  0xaa   :  { %v138_v3 = vpop.permute.xlu1 %137  ;;  %420 = vmatpush3.bf16.msra.mxu0 %v417_v0 }
  0xab   :  { %v143_v4 = vadd.f32 %v138_v3, %v115_v2 }
  0xad   :  { %v147_v6 = vmax.f32 %v143_v4, 0.0 }
  0xae   :  { %v164_v13 = vpop.permute.xlu1 %163 }
  0xaf   :  { %v421_v7 = vpack.c.bf16 %v147_v6, %v146_v5 }
  0xb1   :  { %422 = vmatprep.subr.bf16.mxu0 %v421_v7 }
  0xb2   :  { %424 = vmatpush3.bf16.msra.mxu0 %v421_v7  ;;  %v174_v20 = vpop.permute.xlu1 %173 }
  0xb5   :  { %401 = vmatmul.mubr.msk.f32.vlgmr.msra.gmra.mrb[0].mxu0 %vm176_vm0, %v149_v8 }
  0xb6   :  { %403 = vmatprep.mubr.msk.f32.mxu0 %vm176_vm0, %v150_v9 }
  0xb9   :  { %404 = vmatmul.mubr.msk.f32.gmra.mrb[2].mxu0 %vm176_vm0, %v151_v10 }
 0x188   :  { %v402_v15 = vpop.f32.mrb[0].mxu0 }
 0x189   :  { %v261_v16 = vadd.f32 %v402_v15, %v164_v13  ;;  %v255_v17 = vpop.f32.mrb[1].mxu0 }
 0x18a   :  { %v256_v18 = vadd.f32 %v255_v17, %v159_v14 }
 0x18b   :  { %v275_v19 = vmax.f32 %v261_v16, 0.0 }
 0x18c   :  { %v274_v21 = vmax.f32 %v256_v18, 0.0  ;;  %v405_v22 = vpop.f32.mrb[2].mxu0 }
 0x18d   :  { %v271_v24 = vadd.f32 %v405_v22, %v174_v20  ;;  %v265_v25 = vpop.f32.mrb[3].mxu0 }
 0x18e   :  { %v266_v26 = vadd.f32 %v265_v25, %v169_v23  ;;  %v426_v27 = vpack.c.bf16 %v275_v19, %v274_v21 }
 0x18f   :  { %v277_v28 = vmax.f32 %v271_v24, 0.0 }
 0x190   :  { %v276_v29 = vmax.f32 %v266_v26, 0.0  ;;  %427 = vmatpush3.bf16.msra.mxu1 %v426_v27 }
 0x191   :  { %428 = vmatprep.subr.bf16.mxu1 %v473_v11 }
 0x192   :  { %v429_v30 = vpack.c.bf16 %v277_v28, %v276_v29 }
 0x194   :  { %430 = vmatpush3.bf16.msra.mxu1 %v429_v30 }
 0x197   :  { %415 = vmatmul.mubr.msk.f32.vlgmr.msra.gmra.mrb[0].mxu1 %vm176_vm0, %v278_v31 }
 0x26a   :  { %v354_v33 = vpop.f32.mrb[0].mxu1 }
 0x26b   :  { %v355_v34 = vadd.f32 %v354_v33, %v283_v32  ;;  %v416_v35 = vpop.f32.mrb[1].mxu1 }
 0x26d   :  { %359 = vst.msk [vmem:[#allocation2] sm:$0x3] %vm358_vm2, %v355_v34 }
 0x26e   :  { %457 = shalt.err (!%p454_p4)
}
 0x26f   :  { %s458_s14 = scalar_lea.hbm %s598_s7, 32 }
 0x270   :  { %p459_p5 = scmp.ne.s32.totalorder %s598_s7, %s458_s14  ;;  %p462_p6 = scmp.lt.u32.totalorder %s458_s14, %s598_s7 }
 0x272   :  { %p464_p7 = pnand %p462_p6, %p459_p5 }
 0x274   :  { %467 = shalt.err (!%p464_p7)
}
 0x275   :  { %369 = dma.vmem_to_hbm [thread:$0]  %s367_s11, 32, %s598_s7, [#allocation3]  }
 0x276   :  { %468 = dma.done.wait [#allocation3], 32  }
 0x277   :  { %469 = vsyncadd [#allocation3], 4294967264 }
 0x278   :  { %373 = vsyncpa [#allocation3], 1 }

</bundles_post_ra>
